<compile_context>
chip_gen: v7x
topology: tpu7x:2x2x1
jax: 0.10.0
libtpu: 0.0.40
codegen_flags: <defaults>
</compile_context>

<pallas_src>
import functools

import jax
import jax.numpy as jnp
from jax.experimental import pallas as pl
from jax.experimental.pallas import tpu as pltpu


def _round_up(x, m):
    return (x + m - 1) // m * m


# ---------------------------------------------------------------------------
# Kernel
# ---------------------------------------------------------------------------
def _multi_env_kernel(num_group, accumulator, has_bias, *refs):
    """Vectorized multi-group embedding gather + accumulate.

    env_ref    : VMEM (block_b, num_group) int32
    tables_ref : VMEM (num_group, num_env, hidden)
    bias_ref   : VMEM (1, hidden)              [present only when has_bias]
    out_ref    : VMEM (block_b, hidden)
    """
    if has_bias:
        env_ref, tables_ref, bias_ref, out_ref = refs
    else:
        env_ref, tables_ref, out_ref = refs
        bias_ref = None

    block_b = out_ref.shape[0]
    num_env = tables_ref.shape[1]
    tdtype = tables_ref.dtype

    # One-hot selector built once per block; gather = one MXU matmul per group.
    env_iota = jax.lax.broadcasted_iota(jnp.int32, (block_b, num_env), 1)
    envs = env_ref[...]                                     # (block_b, num_group)

    def gather(g):
        idx = envs[:, g:g + 1]                              # (block_b, 1)
        onehot = (env_iota == idx).astype(tdtype)           # (block_b, num_env)
        # Exact gather + f32 accumulation on the MXU.
        return jnp.dot(onehot, tables_ref[g],
                       preferred_element_type=jnp.float32)  # (block_b, hidden)

    if accumulator == "max":
        acc = gather(0)
        for g in range(1, num_group):
            acc = jnp.maximum(acc, gather(g))
    else:  # sum / mean (and folded linear)
        acc = gather(0)
        for g in range(1, num_group):
            acc = acc + gather(g)
        if accumulator == "mean":
            acc = acc * (1.0 / num_group)

    if bias_ref is not None:
        acc = acc + bias_ref[...]                           # (1,H) -> (block_b,H)

    out_ref[...] = acc.astype(out_ref.dtype)                # single dense store


# ---------------------------------------------------------------------------
# Wrapper
# ---------------------------------------------------------------------------
def multi_env_forward(envs, tables, accumulator, lin_w=None, lin_b=None,
                      block_b=256):
    """envs: (batch, num_group) int32; tables: (num_group, num_env, hidden).

    Returns (batch, hidden_dim), matching MultiEnv.forward.
    """
    batch, num_group = envs.shape
    g, num_env, hidden = tables.shape
    assert g == num_group

    bias = None
    if accumulator == "linear":
        assert lin_w is not None and lin_b is not None
        # concat-then-linear == sum_g emb_g @ W_g^T : fold the weight into the
        # tables (G tiny matmuls run once in XLA), then run the sum path.
        w_r = lin_w.reshape(hidden, num_group, hidden)        # (out, g, in)
        tables = jnp.einsum('geh,ogh->geo', tables, w_r)      # effective tables
        bias = lin_b.reshape(1, hidden).astype(jnp.float32)
        accumulator = "sum"
        has_bias = True
    elif accumulator in ("sum", "mean", "max"):
        has_bias = False
    else:
        raise NotImplementedError(f"unsupported accumulator type {accumulator}")

    out_dtype = tables.dtype

    # Pad ragged batches up to a multiple of the block size (index 0 is always
    # valid; padded rows are sliced off afterwards).
    block_b = min(block_b, _round_up(batch, 8))
    padded_batch = _round_up(batch, block_b)
    if padded_batch != batch:
        envs = jnp.pad(envs, ((0, padded_batch - batch), (0, 0)))
    grid = (padded_batch // block_b,)

    kernel = functools.partial(_multi_env_kernel, num_group, accumulator,
                               has_bias)

    in_specs = [
        pl.BlockSpec((block_b, num_group), lambda i: (i, 0)),
        pl.BlockSpec((num_group, num_env, hidden), lambda i: (0, 0, 0)),
    ]
    args = [envs, tables]
    if has_bias:
        in_specs.append(pl.BlockSpec((1, hidden), lambda i: (0, 0)))
        args.append(bias)

    out = pl.pallas_call(
        kernel,
        out_shape=jax.ShapeDtypeStruct((padded_batch, hidden), out_dtype),
        grid_spec=pl.GridSpec(
            grid=grid,
            in_specs=in_specs,
            out_specs=pl.BlockSpec((block_b, hidden), lambda i: (i, 0)),
        ),
        compiler_params=pltpu.CompilerParams(
            dimension_semantics=("parallel",)),
    )(*args)
    return out[:batch]


# ---------------------------------------------------------------------------
# Pure-JAX reference (mirrors the PyTorch forward)
# ---------------------------------------------------------------------------
def multi_env_reference(envs, tables, accumulator, lin_w=None, lin_b=None):
    # embeddings[g, b] = tables[g, envs[b, g]]  -> (num_group, batch, hidden)
    emb = jax.vmap(lambda t, idx: t[idx], in_axes=(0, 1))(tables, envs)
    if accumulator == "sum":
        return emb.sum(axis=0)
    if accumulator == "mean":
        return emb.mean(axis=0)
    if accumulator == "max":
        return emb.max(axis=0)
    if accumulator == "linear":
        g, b, h = emb.shape
        x = jnp.transpose(emb, (1, 0, 2)).reshape(b, g * h)
        return x @ lin_w.T + lin_b
    raise NotImplementedError(accumulator)


# ---------------------------------------------------------------------------
if __name__ == "__main__":
    num_group, num_env, hidden_dim, batch = 4, 16, 128, 10  # ragged batch

    key = jax.random.PRNGKey(0)
    k_tab, k_env, k_w, k_b = jax.random.split(key, 4)

    # Deterministic synthetic parameters (shapes match MultiEnv.__init__).
    tables = jax.random.normal(
        k_tab, (num_group, num_env, hidden_dim), jnp.float32)
    lin_w = jax.random.normal(
        k_w, (hidden_dim, num_group * hidden_dim), jnp.float32) * (
            1.0 / jnp.sqrt(num_group * hidden_dim))
    lin_b = jax.random.normal(k_b, (hidden_dim,), jnp.float32) * 0.01

    envs = jax.random.randint(
        k_env, (batch, num_group), 0, num_env, dtype=jnp.int32)

    ok = True
    for acc in ("sum", "mean", "max", "linear"):
        out = multi_env_forward(envs, tables, acc, lin_w, lin_b)
        out = jax.block_until_ready(out)
        ref = multi_env_reference(envs, tables, acc, lin_w, lin_b)
        if not jnp.allclose(out, ref, atol=1e-4, rtol=1e-4):
            ok = False
            print(f"MISMATCH for accumulator={acc}: "
                  f"max err {jnp.max(jnp.abs(out - ref))}")

    if ok:
        print("KERNEL_OK")
</pallas_src>

<mosaic_0001>
module attributes {stable_mosaic.version = 11 : i64} {
  func.func @_multi_env_kernel(%arg0: i32, %arg1: memref<16x4xi32, #tpu.memory_space<vmem>>, %arg2: memref<4x16x128xf32, #tpu.memory_space<vmem>>, %arg3: memref<16x128xf32, #tpu.memory_space<vmem>>) attributes {dimension_semantics = [#tpu.dimension_semantics<parallel>], iteration_bounds = array<i64: 1>, scalar_prefetch = 0 : i64, scratch_operands = 0 : i64, tpu.core_type = #tpu.core_type<tc>, window_params = [{transform_indices = @transform_0, window_bounds = array<i64: 16, 4>}, {pipeline_mode = #tpu.pipeline_mode<synchronous>, transform_indices = @transform_1, window_bounds = array<i64: 4, 16, 128>}, {transform_indices = @transform_2, window_bounds = array<i64: 16, 128>}]} {
    %0 = tpu.iota {dimensions = array<i32: 1>} : vector<16x16xi32>
    %c0 = arith.constant 0 : index
    %c0_0 = arith.constant 0 : index
    %1 = vector.load %arg1[%c0, %c0_0] : memref<16x4xi32, #tpu.memory_space<vmem>>, vector<16x4xi32>
    %2 = vector.extract_strided_slice %1 {offsets = [0, 0], sizes = [16, 1], strides = [1, 1]} : vector<16x4xi32> to vector<16x1xi32>
    %3 = vector.broadcast %2 : vector<16x1xi32> to vector<16x16xi32>
    %4 = arith.cmpi eq, %0, %3 : vector<16x16xi32>
    %5 = arith.extui %4 : vector<16x16xi1> to vector<16x16xi32>
    %6 = arith.sitofp %5 : vector<16x16xi32> to vector<16x16xf32>
    %c0_1 = arith.constant 0 : index
    %c0_2 = arith.constant 0 : index
    %c0_3 = arith.constant 0 : index
    %7 = vector.load %arg2[%c0_1, %c0_2, %c0_3] : memref<4x16x128xf32, #tpu.memory_space<vmem>>, vector<1x16x128xf32>
    %8 = vector.shape_cast %7 : vector<1x16x128xf32> to vector<16x128xf32>
    %cst = arith.constant dense<0.000000e+00> : vector<16x128xf32>
    %9 = tpu.matmul %6, %8, %cst {dimension_numbers = #tpu.dot_dimension_numbers<[1], [0], [0], [1], [0, 0, 1, 1], [], []>} : vector<16x16xf32>, vector<16x128xf32>, vector<16x128xf32> -> vector<16x128xf32>
    %10 = vector.extract_strided_slice %1 {offsets = [0, 1], sizes = [16, 1], strides = [1, 1]} : vector<16x4xi32> to vector<16x1xi32>
    %11 = vector.broadcast %10 : vector<16x1xi32> to vector<16x16xi32>
    %12 = arith.cmpi eq, %0, %11 : vector<16x16xi32>
    %13 = arith.extui %12 : vector<16x16xi1> to vector<16x16xi32>
    %14 = arith.sitofp %13 : vector<16x16xi32> to vector<16x16xf32>
    %c1 = arith.constant 1 : index
    %c0_4 = arith.constant 0 : index
    %c0_5 = arith.constant 0 : index
    %15 = vector.load %arg2[%c1, %c0_4, %c0_5] : memref<4x16x128xf32, #tpu.memory_space<vmem>>, vector<1x16x128xf32>
    %16 = vector.shape_cast %15 : vector<1x16x128xf32> to vector<16x128xf32>
    %cst_6 = arith.constant dense<0.000000e+00> : vector<16x128xf32>
    %17 = tpu.matmul %14, %16, %cst_6 {dimension_numbers = #tpu.dot_dimension_numbers<[1], [0], [0], [1], [0, 0, 1, 1], [], []>} : vector<16x16xf32>, vector<16x128xf32>, vector<16x128xf32> -> vector<16x128xf32>
    %18 = arith.addf %9, %17 : vector<16x128xf32>
    %19 = vector.extract_strided_slice %1 {offsets = [0, 2], sizes = [16, 1], strides = [1, 1]} : vector<16x4xi32> to vector<16x1xi32>
    %20 = vector.broadcast %19 : vector<16x1xi32> to vector<16x16xi32>
    %21 = arith.cmpi eq, %0, %20 : vector<16x16xi32>
    %22 = arith.extui %21 : vector<16x16xi1> to vector<16x16xi32>
    %23 = arith.sitofp %22 : vector<16x16xi32> to vector<16x16xf32>
    %c2 = arith.constant 2 : index
    %c0_7 = arith.constant 0 : index
    %c0_8 = arith.constant 0 : index
    %24 = vector.load %arg2[%c2, %c0_7, %c0_8] : memref<4x16x128xf32, #tpu.memory_space<vmem>>, vector<1x16x128xf32>
    %25 = vector.shape_cast %24 : vector<1x16x128xf32> to vector<16x128xf32>
    %cst_9 = arith.constant dense<0.000000e+00> : vector<16x128xf32>
    %26 = tpu.matmul %23, %25, %cst_9 {dimension_numbers = #tpu.dot_dimension_numbers<[1], [0], [0], [1], [0, 0, 1, 1], [], []>} : vector<16x16xf32>, vector<16x128xf32>, vector<16x128xf32> -> vector<16x128xf32>
    %27 = arith.addf %18, %26 : vector<16x128xf32>
    %28 = vector.extract_strided_slice %1 {offsets = [0, 3], sizes = [16, 1], strides = [1, 1]} : vector<16x4xi32> to vector<16x1xi32>
    %29 = vector.broadcast %28 : vector<16x1xi32> to vector<16x16xi32>
    %30 = arith.cmpi eq, %0, %29 : vector<16x16xi32>
    %31 = arith.extui %30 : vector<16x16xi1> to vector<16x16xi32>
    %32 = arith.sitofp %31 : vector<16x16xi32> to vector<16x16xf32>
    %c3 = arith.constant 3 : index
    %c0_10 = arith.constant 0 : index
    %c0_11 = arith.constant 0 : index
    %33 = vector.load %arg2[%c3, %c0_10, %c0_11] : memref<4x16x128xf32, #tpu.memory_space<vmem>>, vector<1x16x128xf32>
    %34 = vector.shape_cast %33 : vector<1x16x128xf32> to vector<16x128xf32>
    %cst_12 = arith.constant dense<0.000000e+00> : vector<16x128xf32>
    %35 = tpu.matmul %32, %34, %cst_12 {dimension_numbers = #tpu.dot_dimension_numbers<[1], [0], [0], [1], [0, 0, 1, 1], [], []>} : vector<16x16xf32>, vector<16x128xf32>, vector<16x128xf32> -> vector<16x128xf32>
    %36 = arith.addf %27, %35 : vector<16x128xf32>
    %c0_13 = arith.constant 0 : index
    %c0_14 = arith.constant 0 : index
    %37 = vector.load %arg3[%c0_13, %c0_14] : memref<16x128xf32, #tpu.memory_space<vmem>>, vector<16x128xf32>
    tpu.vector_store %arg3[%c0_13, %c0_14], %36 {strides = array<i32>} : memref<16x128xf32, #tpu.memory_space<vmem>>, vector<16x128xf32>,
    return
  }
  func.func @transform_0(%arg0: i32) -> (i32, i32) {
    %c0_i32 = arith.constant 0 : i32
    %c0_i32_0 = arith.constant 0 : i32
    return %arg0, %c0_i32 : i32, i32
  }
  func.func @transform_1(%arg0: i32) -> (i32, i32, i32) {
    %c0_i32 = arith.constant 0 : i32
    %c0_i32_0 = arith.constant 0 : i32
    %c0_i32_1 = arith.constant 0 : i32
    %c0_i32_2 = arith.constant 0 : i32
    return %c0_i32, %c0_i32_0, %c0_i32_1 : i32, i32, i32
  }
  func.func @transform_2(%arg0: i32) -> (i32, i32) {
    %c0_i32 = arith.constant 0 : i32
    %c0_i32_0 = arith.constant 0 : i32
    return %arg0, %c0_i32 : i32, i32
  }
}

</mosaic_0001>

<bundles_post_ra>
// kernel: tpu_custom_call.1
= control target key start
LH: loop header
LB: loop body
LE: loop exit
PB: predicated region body
PF: predicated region fallthrough
CT: control target
= control target key end

     0   :  { %7 = vsyncpa [#allocation3], 0  ;;  %s651_s0 = inlined_call_operand.vmem [shape: s32[16,4], index: 0, kind: input, shape index: {}]   ;;  %s652_s1 = inlined_call_operand.hbm [shape: f32[4,16,128], index: 1, kind: input, shape index: {}]   ;;  %s653_s2 = inlined_call_operand.hbm [shape: f32[16,128], index: 2, kind: output, shape index: {}]  }
   0x1   :  { %8 = vsyncpa [#allocation4], 0  ;;  %s583_s9 = smov [#allocation2]   ;;  %s535_s13 = scalar_lea.hbm %s652_s1, 1024 }
   0x2   :  { %s16_s10 = sshll.u32 %s583_s9, 4  ;;  %p536_p0 = scmp.ne.s32.totalorder %s652_s1, %s535_s13  ;;  %s17_s10 = int_to_ptr.vmem [resolvable:$true] %s16_s10 }
   0x3   :  { %p539_p1 = scmp.lt.u32.totalorder %s535_s13, %s652_s1 }
   0x5   :  { %p541_p2 = pnand %p539_p1, %p536_p0 }
   0x7   :  { %544 = shalt.err (!%p541_p2)
}
   0x8   :  { %s545_s18 = scalar_lea.vmem %s17_s10, 1024  ;;  %p550_p4 = scmp.lt.s32.totalorder %s17_s10, %s17_s10 }
   0x9   :  { %p546_p3 = scmp.ne.s32.totalorder %s17_s10, %s545_s18  ;;  %p551_p5 = scmp.lt.s32.totalorder %s545_s18, %s545_s18 }
   0xb   :  { %p552_p6 = por %p551_p5, %p550_p4 }
   0xd   :  { %p553_p7 = pnand %p552_p6, %p546_p3 }
   0xf   :  { %556 = shalt.err (!%p553_p7)
}
  0x10   :  { %s584_s19 = smov 128   ;;  %s585_s20 = smov 8  }
  0x11   :  { %22 = dma.hbm_to_vmem [thread:$0]  %s652_s1, 1024, %s17_s10, [#allocation3], %s584_s19, %s584_s19, %s585_s20  }
  0x12   :  { %579 = dma.done.wait [#allocation3], 1024  }
  0x13   :  { %580 = vsyncadd [#allocation3], 4294966272  ;;  %v586_v0 = vmov 1   ;;  %v29_v1 = vld [vmem:[%s651_s0 + $0x8] sm:$0xff]  ;;  %v28_v2 = vld [vmem:[%s651_s0] sm:$0xff]  ;;  %v587_v9 = vmov 2   ;;  %v26_v18 = vlaneseq }
  0x14   :  { %530 = vset.pattern.permute.xlu1 %v586_v0  ;;  %528 = vset.pattern.permute.xlu0 %v586_v0  ;;  %v57_v3 = vld [vmem:[#allocation2 + $0x10] sm:$0xff]  ;;  %v58_v4 = vld [vmem:[#allocation2 + $0x18] sm:$0xff]  ;;  %v235_v6 = vld [vmem:[#allocation2 + $0x20] sm:$0xff]  ;;  %v588_v10 = vmov 0   ;;  %v589_v11 = vmov 3   ;;  %vm59_vm0 = vcmask 130048  }
  0x15   :  { %48 = vperm.xlu1 %530, %v29_v1   ;;  %45 = vperm.xlu0 %528, %v28_v2   ;;  %v497_v5 = vpack.c.bf16 %v58_v4, %v57_v3  ;;  %v236_v7 = vld [vmem:[#allocation2 + $0x28] sm:$0xff]  ;;  %v42_v12 = vld [vmem:[#allocation2] sm:$0xff]  ;;  %v333_v15 = vld [vmem:[#allocation2 + $0x30] sm:$0xff]  ;;  %v27_v19 = vand.u32 127, %v26_v18  ;;  %v590_v22 = vmov 0.0   ;;  %s591_s0 = smov [#allocation5]  }
  0x16   :  { %v505_v8 = vpack.c.bf16 %v236_v7, %v235_v6  ;;  %v43_v13 = vld [vmem:[#allocation2 + $0x8] sm:$0xff]  ;;  %v334_v16 = vld [vmem:[#allocation2 + $0x38] sm:$0xff]  ;;  %s425_s1 = sshll.u32 %s591_s0, 4  ;;  %s426_s1 = int_to_ptr.vmem [resolvable:$true] %s425_s1 }
  0x17   :  { %498 = vmatprep.subr.bf16.mxu1 %v497_v5  ;;  %v501_v14 = vpack.c.bf16 %v43_v13, %v42_v12  ;;  %v509_v17 = vpack.c.bf16 %v334_v16, %v333_v15  ;;  %s557_s27 = scalar_lea.vmem %s426_s1, 256  ;;  %p562_p9 = scmp.lt.s32.totalorder %s426_s1, %s426_s1 }
  0x18   :  { %500 = vmatpush3.bf16.msra.mxu1 %v497_v5  ;;  %506 = vmatprep.subr.bf16.mxu0 %v505_v8  ;;  %p558_p8 = scmp.ne.s32.totalorder %s426_s1, %s557_s27  ;;  %p563_p10 = scmp.lt.s32.totalorder %s557_s27, %s557_s27 }
  0x19   :  { %531 = vset.pattern.permute.xlu1 %v587_v9  ;;  %529 = vset.pattern.permute.xlu0 %v587_v9 }
  0x1a   :  { %226 = vperm.xlu1 %531, %v29_v1   ;;  %223 = vperm.xlu0 %529, %v28_v2   ;;  %p564_p11 = por %p563_p10, %p562_p9 }
  0x1b   :  { %508 = vmatpush3.bf16.msra.mxu0 %v505_v8  ;;  %502 = vmatprep.subr.bf16.mxu1 %v501_v14 }
  0x1c   :  { %510 = vmatprep.subr.bf16.mxu0 %v509_v17  ;;  %p565_p12 = pnand %p564_p11, %p558_p8 }
  0x1e   :  { %532 = vset.pattern.permute.xlu1 %v588_v10  ;;  %533 = vset.pattern.permute.xlu0 %v589_v11 }
  0x1f   :  { %31 = vperm.xlu1 %532, %v28_v2   ;;  %321 = vperm.xlu0 %533, %v28_v2  }
  0x23   :  { %34 = vperm.xlu1 %532, %v29_v1  }
  0x27   :  { %534 = vset.pattern.permute.xlu1 %v589_v11 }
  0x28   :  { %324 = vperm.xlu1 %534, %v29_v1  }
  0x94   :  { %v49_v20 = vpop.permute.xlu1 %48  ;;  %v46_v21 = vpop.permute.xlu0 %45 }
  0x95   :  { %vm51_vm1 = vcmp.eq.s32.totalorder %v27_v19, %v49_v20  ;;  %vm50_vm2 = vcmp.eq.s32.totalorder %v27_v19, %v46_v21 }
  0x96   :  { %v440_v23 = vsel %vm51_vm1, 1.0, %v590_v22  ;;  %v439_v24 = vsel %vm50_vm2, 1.0, %v590_v22 }
  0x97   :  { %473 = vmatprep.mubr.msk.f32.mxu1 %vm59_vm0, %v439_v24 }
  0x98   :  { %474 = vmatmul.mubr.msk.f32.vlgmr.msra.gmra.mrb[0].mxu1 %vm59_vm0, %v440_v23 }
  0x99   :  { %v227_v25 = vpop.permute.xlu1 %226  ;;  %v224_v26 = vpop.permute.xlu0 %223  ;;  %504 = vmatpush3.bf16.msra.mxu1 %v501_v14 }
  0x9a   :  { %vm229_vm3 = vcmp.eq.s32.totalorder %v27_v19, %v227_v25  ;;  %vm228_vm4 = vcmp.eq.s32.totalorder %v27_v19, %v224_v26 }
  0x9b   :  { %v446_v27 = vsel %vm229_vm3, 1.0, %v590_v22  ;;  %v445_v28 = vsel %vm228_vm4, 1.0, %v590_v22 }
  0x9c   :  { %487 = vmatprep.mubr.msk.f32.mxu0 %vm59_vm0, %v445_v28 }
  0x9d   :  { %488 = vmatmul.mubr.msk.f32.vlgmr.msra.gmra.mrb[0].mxu0 %vm59_vm0, %v446_v27 }
  0x9e   :  { %v32_v29 = vpop.permute.xlu1 %31  ;;  %512 = vmatpush3.bf16.msra.mxu0 %v509_v17  ;;  %v322_v30 = vpop.permute.xlu0 %321 }
  0x9f   :  { %vm36_vm5 = vcmp.eq.s32.totalorder %v27_v19, %v32_v29  ;;  %vm326_vm6 = vcmp.eq.s32.totalorder %v27_v19, %v322_v30 }
  0xa0   :  { %v437_v31 = vsel %vm36_vm5, 1.0, %v590_v22  ;;  %v449_v32 = vsel %vm326_vm6, 1.0, %v590_v22 }
  0xa1   :  { %480 = vmatprep.mubr.msk.f32.mxu1 %vm59_vm0, %v437_v31  ;;  %494 = vmatprep.mubr.msk.f32.mxu0 %vm59_vm0, %v449_v32 }
  0xa2   :  { %v35_v33 = vpop.permute.xlu1 %34 }
  0xa3   :  { %vm37_vm7 = vcmp.eq.s32.totalorder %v27_v19, %v35_v33 }
  0xa4   :  { %v438_v34 = vsel %vm37_vm7, 1.0, %v590_v22 }
  0xa5   :  { %481 = vmatmul.mubr.msk.f32.vlgmr.msra.gmra.mrb[0].mxu1 %vm59_vm0, %v438_v34 }
  0xa7   :  { %v325_v35 = vpop.permute.xlu1 %324 }
  0xa8   :  { %vm327_vm8 = vcmp.eq.s32.totalorder %v27_v19, %v325_v35 }
  0xa9   :  { %v450_v36 = vsel %vm327_vm8, 1.0, %v590_v22 }
  0xaa   :  { %495 = vmatmul.mubr.msk.f32.vlgmr.msra.gmra.mrb[0].mxu0 %vm59_vm0, %v450_v36 }
 0x178   :  { %v482_v37 = vpop.f32.mrb[0].mxu1 }
 0x179   :  { %v213_v38 = vpop.f32.mrb[1].mxu1 }
 0x17d   :  { %v496_v39 = vpop.f32.mrb[0].mxu0 }
 0x17e   :  { %v513_v40 = vadd.f32 %v496_v39, %v482_v37  ;;  %v407_v41 = vpop.f32.mrb[1].mxu0 }
 0x17f   :  { %v514_v42 = vadd.f32 %v407_v41, %v213_v38 }
 0x180   :  { %419 = vst [vmem:[#allocation5 + $0x8] sm:$0xff] %v513_v40 }
 0x181   :  { %418 = vst [vmem:[#allocation5] sm:$0xff] %v514_v42 }
 0x182   :  { %568 = shalt.err (!%p565_p12)
}
 0x183   :  { %s569_s30 = scalar_lea.hbm %s653_s2, 256 }
 0x184   :  { %p570_p13 = scmp.ne.s32.totalorder %s653_s2, %s569_s30  ;;  %p573_p0 = scmp.lt.u32.totalorder %s569_s30, %s653_s2 }
 0x186   :  { %p575_p1 = pnand %p573_p0, %p570_p13 }
 0x188   :  { %578 = shalt.err (!%p575_p1)
}
 0x189   :  { %431 = dma.vmem_to_hbm [thread:$0]  %s426_s1, 256, %s653_s2, [#allocation4], %s584_s19, %s584_s19, %s585_s20  }
 0x18a   :  { %581 = dma.done.wait [#allocation4], 256  }
 0x18b   :  { %582 = vsyncadd [#allocation4], 4294967040 }
 0x18c   :  { %435 = vsyncpa [#allocation3], 1 }
 0x18d   :  { %436 = vsyncpa [#allocation4], 1 }

</bundles_post_ra>
